<compile_context>
chip_gen: v7x
topology: tpu7x:2x2x1
jax: 0.10.0
libtpu: 0.0.40
codegen_flags: <defaults>
</compile_context>

<pallas_src>
import functools

import jax
import jax.numpy as jnp
from jax.experimental import pallas as pl
from jax.experimental.pallas import tpu as pltpu


def _round_up(n: int, m: int) -> int:
    return (n + m - 1) // m * m


def stack_lstm_kernel(x_ref, h_ref, c_ref, w_ref, b_ref,
                      next_h_ref, next_c_ref, *, num_layers, hp):
    """All L LSTMCell layers, unrolled inside one grid step.

    x_ref:      (B, Hp)            layer-0 input (f32, zero-padded lanes)
    h_ref/c_ref:(L, B, Hp)         previous states
    w_ref:      (L, 2*Hp, 4*Hp)    bf16, [W_ih^T ; W_hh^T] per layer, gate-block padded
    b_ref:      (L, 1, 4*Hp)       f32, b_ih + b_hh, gate-block padded
    """
    x = x_ref[...].astype(jnp.float32)                     # (B, Hp)

    for layer in range(num_layers):                        # static unroll (sequential dep)
        h = h_ref[layer].astype(jnp.float32)               # (B, Hp)
        c = c_ref[layer].astype(jnp.float32)               # (B, Hp)

        # One fused MXU matmul: K = 2*Hp, bf16 operands, f32 accumulate.
        xh = jnp.concatenate([x, h], axis=-1).astype(jnp.bfloat16)   # (B, 2*Hp)
        gates = (jnp.dot(xh, w_ref[layer], preferred_element_type=jnp.float32)
                 + b_ref[layer])                           # (B, 4*Hp), f32

        # 128-lane-aligned gate slices (torch gate order i, f, g, o).
        i_g = jax.nn.sigmoid(gates[:, 0 * hp:1 * hp])
        f_g = jax.nn.sigmoid(gates[:, 1 * hp:2 * hp])
        g_g = jnp.tanh(gates[:, 2 * hp:3 * hp])
        o_g = jax.nn.sigmoid(gates[:, 3 * hp:4 * hp])

        c_new = f_g * c + i_g * g_g
        h_new = o_g * jnp.tanh(c_new)

        next_h_ref[layer] = h_new.astype(next_h_ref.dtype)
        next_c_ref[layer] = c_new.astype(next_c_ref.dtype)

        x = h_new                                          # f32 carry to next layer


def prepare_stack_lstm_params(w_ih, w_hh, b_ih, b_hh):
    """Pack torch.nn.LSTMCell params for the kernel (call once at init).

    w_ih, w_hh: (L, 4H, H) torch layout (weight_ih / weight_hh)
    b_ih, b_hh: (L, 4H)
    Returns:
      w_cat: (L, 2*Hp, 4*Hp) bf16  -- [W_ih^T ; W_hh^T], zero-padded per gate block
      bias:  (L, 1, 4*Hp)     f32  -- b_ih + b_hh, zero-padded per gate block
    with Hp = round_up(H, 128) (lane-dense hidden dim).
    """
    L, four_h, H = w_ih.shape
    assert four_h == 4 * H
    Hp = _round_up(H, 128)

    def pack_w(w):
        w = jnp.transpose(w, (0, 2, 1))                    # (L, H, 4H): x @ W layout
        w = w.reshape(L, H, 4, H)                          # split gate blocks
        w = jnp.pad(w, ((0, 0), (0, Hp - H), (0, 0), (0, Hp - H)))  # pad K and each gate
        return w.reshape(L, Hp, 4 * Hp)

    w_cat = jnp.concatenate([pack_w(w_ih), pack_w(w_hh)], axis=1)   # (L, 2*Hp, 4*Hp)
    w_cat = w_cat.astype(jnp.bfloat16)

    b = (b_ih + b_hh).reshape(L, 4, H)
    b = jnp.pad(b, ((0, 0), (0, 0), (0, Hp - H))).reshape(L, 1, 4 * Hp)
    return w_cat, b.astype(jnp.float32)


def stack_lstm_forward(x, prev_h, prev_c, w_cat, bias):
    """x: (B, H); prev_h/prev_c: (L, B, H); w_cat/bias from prepare_stack_lstm_params."""
    L, B, H = prev_h.shape
    Hp = w_cat.shape[1] // 2
    assert w_cat.shape == (L, 2 * Hp, 4 * Hp)
    assert bias.shape == (L, 1, 4 * Hp)

    pad = Hp - H
    if pad:
        x = jnp.pad(x, ((0, 0), (0, pad)))
        prev_h = jnp.pad(prev_h, ((0, 0), (0, 0), (0, pad)))
        prev_c = jnp.pad(prev_c, ((0, 0), (0, 0), (0, pad)))

    kernel = functools.partial(stack_lstm_kernel, num_layers=L, hp=Hp)

    next_h, next_c = pl.pallas_call(
        kernel,
        out_shape=(jax.ShapeDtypeStruct((L, B, Hp), x.dtype),
                   jax.ShapeDtypeStruct((L, B, Hp), x.dtype)),
        grid=(1,),  # whole problem resident in VMEM; grid collapsed on purpose
        in_specs=[
            pl.BlockSpec((B, Hp), lambda i: (0, 0)),                   # x
            pl.BlockSpec((L, B, Hp), lambda i: (0, 0, 0)),             # prev_h
            pl.BlockSpec((L, B, Hp), lambda i: (0, 0, 0)),             # prev_c
            pl.BlockSpec((L, 2 * Hp, 4 * Hp), lambda i: (0, 0, 0)),    # [W_ih;W_hh] bf16
            pl.BlockSpec((L, 1, 4 * Hp), lambda i: (0, 0, 0)),         # bias
        ],
        out_specs=(
            pl.BlockSpec((L, B, Hp), lambda i: (0, 0, 0)),             # next_h
            pl.BlockSpec((L, B, Hp), lambda i: (0, 0, 0)),             # next_c
        ),
        compiler_params=pltpu.CompilerParams(
            dimension_semantics=("arbitrary",)),
    )(x, prev_h, prev_c, w_cat, bias)

    if pad:
        next_h = next_h[..., :H]
        next_c = next_c[..., :H]
    return next_h, next_c


def stack_lstm_reference(x, prev_h, prev_c, w_ih, w_hh, b_ih, b_hh,
                         *, emulate_bf16_matmul=False):
    """Pure-JAX reference matching torch.nn.LSTMCell semantics.

    If emulate_bf16_matmul, the matmul operands are rounded to bf16 (f32
    accumulation), mirroring the kernel's MXU input dtype exactly.
    """
    L = prev_h.shape[0]
    bias = b_ih + b_hh
    hs, cs = [], []
    inp = x
    for l in range(L):
        w_i = jnp.transpose(w_ih[l])   # (H, 4H)
        w_h = jnp.transpose(w_hh[l])
        if emulate_bf16_matmul:
            gates = (jnp.dot(inp.astype(jnp.bfloat16), w_i.astype(jnp.bfloat16),
                             preferred_element_type=jnp.float32)
                     + jnp.dot(prev_h[l].astype(jnp.bfloat16), w_h.astype(jnp.bfloat16),
                               preferred_element_type=jnp.float32)
                     + bias[l])
        else:
            gates = inp @ w_i + prev_h[l] @ w_h + bias[l]
        i_g, f_g, g_g, o_g = jnp.split(gates, 4, axis=-1)
        i_g = jax.nn.sigmoid(i_g)
        f_g = jax.nn.sigmoid(f_g)
        g_g = jnp.tanh(g_g)
        o_g = jax.nn.sigmoid(o_g)
        c_new = f_g * prev_c[l] + i_g * g_g
        h_new = o_g * jnp.tanh(c_new)
        hs.append(h_new)
        cs.append(c_new)
        inp = h_new
    return jnp.stack(hs), jnp.stack(cs)


if __name__ == "__main__":
    B, H, L = 8, 32, 2  # batch, hidden_size, num_layers

    key = jax.random.PRNGKey(0)
    ks = jax.random.split(key, 7)
    bound = 1.0 / jnp.sqrt(H)  # torch.nn.LSTMCell default init range

    x = jax.random.normal(ks[0], (B, H), jnp.float32)
    prev_h = jax.random.normal(ks[1], (L, B, H), jnp.float32)
    prev_c = jax.random.normal(ks[2], (L, B, H), jnp.float32)

    # torch.nn.LSTMCell parameter layout: weight_ih/_hh (4H, H), bias_ih/_hh (4H,)
    w_ih = jax.random.uniform(ks[3], (L, 4 * H, H), jnp.float32, -bound, bound)
    w_hh = jax.random.uniform(ks[4], (L, 4 * H, H), jnp.float32, -bound, bound)
    b_ih = jax.random.uniform(ks[5], (L, 4 * H), jnp.float32, -bound, bound)
    b_hh = jax.random.uniform(ks[6], (L, 4 * H), jnp.float32, -bound, bound)

    w_cat, bias = prepare_stack_lstm_params(w_ih, w_hh, b_ih, b_hh)

    next_h, next_c = stack_lstm_forward(x, prev_h, prev_c, w_cat, bias)
    jax.block_until_ready((next_h, next_c))

    # Tight check vs. a reference applying the same bf16 rounding to MXU operands
    # (the bf16 weight storage is the only intended deviation from f32 math).
    ref_h, ref_c = stack_lstm_reference(x, prev_h, prev_c, w_ih, w_hh, b_ih, b_hh,
                                        emulate_bf16_matmul=True)
    assert jnp.allclose(next_h, ref_h, atol=1e-3, rtol=1e-3)
    assert jnp.allclose(next_c, ref_c, atol=1e-3, rtol=1e-3)

    # Loose check vs. the pure-f32 torch.nn.LSTMCell chain.
    ref_h32, ref_c32 = stack_lstm_reference(x, prev_h, prev_c, w_ih, w_hh, b_ih, b_hh)
    assert jnp.allclose(next_h, ref_h32, atol=5e-2, rtol=5e-2)
    assert jnp.allclose(next_c, ref_c32, atol=5e-2, rtol=5e-2)

    print("KERNEL_OK")
</pallas_src>

<mosaic_0001>
module attributes {stable_mosaic.version = 11 : i64} {
  func.func @stack_lstm_kernel(%arg0: i32, %arg1: memref<8x128xf32, #tpu.memory_space<vmem>>, %arg2: memref<2x8x128xf32, #tpu.memory_space<vmem>>, %arg3: memref<2x8x128xf32, #tpu.memory_space<vmem>>, %arg4: memref<2x256x512xbf16, #tpu.memory_space<vmem>>, %arg5: memref<2x1x512xf32, #tpu.memory_space<vmem>>, %arg6: memref<2x8x128xf32, #tpu.memory_space<vmem>>, %arg7: memref<2x8x128xf32, #tpu.memory_space<vmem>>) attributes {dimension_semantics = [#tpu.dimension_semantics<arbitrary>], iteration_bounds = array<i64: 1>, scalar_prefetch = 0 : i64, scratch_operands = 0 : i64, tpu.core_type = #tpu.core_type<tc>, window_params = [{pipeline_mode = #tpu.pipeline_mode<synchronous>, transform_indices = @transform_0, window_bounds = array<i64: 8, 128>}, {pipeline_mode = #tpu.pipeline_mode<synchronous>, transform_indices = @transform_1, window_bounds = array<i64: 2, 8, 128>}, {pipeline_mode = #tpu.pipeline_mode<synchronous>, transform_indices = @transform_2, window_bounds = array<i64: 2, 8, 128>}, {pipeline_mode = #tpu.pipeline_mode<synchronous>, transform_indices = @transform_3, window_bounds = array<i64: 2, 256, 512>}, {pipeline_mode = #tpu.pipeline_mode<synchronous>, transform_indices = @transform_4, window_bounds = array<i64: 2, 1, 512>}, {pipeline_mode = #tpu.pipeline_mode<synchronous>, transform_indices = @transform_5, window_bounds = array<i64: 2, 8, 128>}, {pipeline_mode = #tpu.pipeline_mode<synchronous>, transform_indices = @transform_6, window_bounds = array<i64: 2, 8, 128>}]} {
    %c0 = arith.constant 0 : index
    %c0_0 = arith.constant 0 : index
    %0 = vector.load %arg1[%c0, %c0_0] : memref<8x128xf32, #tpu.memory_space<vmem>>, vector<8x128xf32>
    %c0_1 = arith.constant 0 : index
    %c0_2 = arith.constant 0 : index
    %c0_3 = arith.constant 0 : index
    %1 = vector.load %arg2[%c0_1, %c0_2, %c0_3] : memref<2x8x128xf32, #tpu.memory_space<vmem>>, vector<1x8x128xf32>
    %2 = vector.shape_cast %1 : vector<1x8x128xf32> to vector<8x128xf32>
    %c0_4 = arith.constant 0 : index
    %c0_5 = arith.constant 0 : index
    %c0_6 = arith.constant 0 : index
    %3 = vector.load %arg3[%c0_4, %c0_5, %c0_6] : memref<2x8x128xf32, #tpu.memory_space<vmem>>, vector<1x8x128xf32>
    %4 = vector.shape_cast %3 : vector<1x8x128xf32> to vector<8x128xf32>
    %5 = tpu.concatenate %0, %2 in 1 : vector<8x128xf32>, vector<8x128xf32> -> vector<8x256xf32>
    %6 = arith.truncf %5 : vector<8x256xf32> to vector<8x256xbf16>
    %c0_7 = arith.constant 0 : index
    %c0_8 = arith.constant 0 : index
    %c0_9 = arith.constant 0 : index
    %7 = vector.load %arg4[%c0_7, %c0_8, %c0_9] : memref<2x256x512xbf16, #tpu.memory_space<vmem>>, vector<1x256x512xbf16>
    %8 = vector.shape_cast %7 : vector<1x256x512xbf16> to vector<256x512xbf16>
    %cst = arith.constant dense<0.000000e+00> : vector<8x512xf32>
    %9 = tpu.matmul %6, %8, %cst {dimension_numbers = #tpu.dot_dimension_numbers<[1], [0], [0], [1], [0, 0, 1, 1], [], []>} : vector<8x256xbf16>, vector<256x512xbf16>, vector<8x512xf32> -> vector<8x512xf32>
    %c0_10 = arith.constant 0 : index
    %c0_11 = arith.constant 0 : index
    %c0_12 = arith.constant 0 : index
    %10 = vector.load %arg5[%c0_10, %c0_11, %c0_12] : memref<2x1x512xf32, #tpu.memory_space<vmem>>, vector<1x1x512xf32>
    %11 = vector.shape_cast %10 : vector<1x1x512xf32> to vector<1x512xf32>
    %12 = vector.broadcast %11 : vector<1x512xf32> to vector<8x512xf32>
    %13 = arith.addf %9, %12 : vector<8x512xf32>
    %14 = vector.extract_strided_slice %13 {offsets = [0, 0], sizes = [8, 128], strides = [1, 1]} : vector<8x512xf32> to vector<8x128xf32>
    %15 = arith.negf %14 : vector<8x128xf32>
    %16 = math.exp %15 : vector<8x128xf32>
    %cst_13 = arith.constant 1.000000e+00 : f32
    %17 = vector.broadcast %cst_13 : f32 to vector<8x128xf32>
    %18 = arith.addf %17, %16 : vector<8x128xf32>
    %19 = arith.divf %17, %18 : vector<8x128xf32>
    %20 = vector.extract_strided_slice %13 {offsets = [0, 128], sizes = [8, 128], strides = [1, 1]} : vector<8x512xf32> to vector<8x128xf32>
    %21 = arith.negf %20 : vector<8x128xf32>
    %22 = math.exp %21 : vector<8x128xf32>
    %cst_14 = arith.constant 1.000000e+00 : f32
    %23 = vector.broadcast %cst_14 : f32 to vector<8x128xf32>
    %24 = arith.addf %23, %22 : vector<8x128xf32>
    %25 = arith.divf %23, %24 : vector<8x128xf32>
    %26 = vector.extract_strided_slice %13 {offsets = [0, 256], sizes = [8, 128], strides = [1, 1]} : vector<8x512xf32> to vector<8x128xf32>
    %27 = math.tanh %26 : vector<8x128xf32>
    %28 = vector.extract_strided_slice %13 {offsets = [0, 384], sizes = [8, 128], strides = [1, 1]} : vector<8x512xf32> to vector<8x128xf32>
    %29 = arith.negf %28 : vector<8x128xf32>
    %30 = math.exp %29 : vector<8x128xf32>
    %cst_15 = arith.constant 1.000000e+00 : f32
    %31 = vector.broadcast %cst_15 : f32 to vector<8x128xf32>
    %32 = arith.addf %31, %30 : vector<8x128xf32>
    %33 = arith.divf %31, %32 : vector<8x128xf32>
    %34 = arith.mulf %25, %4 : vector<8x128xf32>
    %35 = arith.mulf %19, %27 : vector<8x128xf32>
    %36 = arith.addf %34, %35 : vector<8x128xf32>
    %37 = math.tanh %36 : vector<8x128xf32>
    %38 = arith.mulf %33, %37 : vector<8x128xf32>
    %c0_16 = arith.constant 0 : index
    %c0_17 = arith.constant 0 : index
    %c0_18 = arith.constant 0 : index
    %39 = vector.load %arg6[%c0_16, %c0_17, %c0_18] : memref<2x8x128xf32, #tpu.memory_space<vmem>>, vector<1x8x128xf32>
    %40 = vector.shape_cast %39 : vector<1x8x128xf32> to vector<8x128xf32>
    %41 = vector.shape_cast %38 : vector<8x128xf32> to vector<1x8x128xf32>
    tpu.vector_store %arg6[%c0_16, %c0_17, %c0_18], %41 {strides = array<i32>} : memref<2x8x128xf32, #tpu.memory_space<vmem>>, vector<1x8x128xf32>,
    %c0_19 = arith.constant 0 : index
    %c0_20 = arith.constant 0 : index
    %c0_21 = arith.constant 0 : index
    %42 = vector.load %arg7[%c0_19, %c0_20, %c0_21] : memref<2x8x128xf32, #tpu.memory_space<vmem>>, vector<1x8x128xf32>
    %43 = vector.shape_cast %42 : vector<1x8x128xf32> to vector<8x128xf32>
    %44 = vector.shape_cast %36 : vector<8x128xf32> to vector<1x8x128xf32>
    tpu.vector_store %arg7[%c0_19, %c0_20, %c0_21], %44 {strides = array<i32>} : memref<2x8x128xf32, #tpu.memory_space<vmem>>, vector<1x8x128xf32>,
    %c1 = arith.constant 1 : index
    %c0_22 = arith.constant 0 : index
    %c0_23 = arith.constant 0 : index
    %45 = vector.load %arg2[%c1, %c0_22, %c0_23] : memref<2x8x128xf32, #tpu.memory_space<vmem>>, vector<1x8x128xf32>
    %46 = vector.shape_cast %45 : vector<1x8x128xf32> to vector<8x128xf32>
    %c1_24 = arith.constant 1 : index
    %c0_25 = arith.constant 0 : index
    %c0_26 = arith.constant 0 : index
    %47 = vector.load %arg3[%c1_24, %c0_25, %c0_26] : memref<2x8x128xf32, #tpu.memory_space<vmem>>, vector<1x8x128xf32>
    %48 = vector.shape_cast %47 : vector<1x8x128xf32> to vector<8x128xf32>
    %49 = tpu.concatenate %38, %46 in 1 : vector<8x128xf32>, vector<8x128xf32> -> vector<8x256xf32>
    %50 = arith.truncf %49 : vector<8x256xf32> to vector<8x256xbf16>
    %c1_27 = arith.constant 1 : index
    %c0_28 = arith.constant 0 : index
    %c0_29 = arith.constant 0 : index
    %51 = vector.load %arg4[%c1_27, %c0_28, %c0_29] : memref<2x256x512xbf16, #tpu.memory_space<vmem>>, vector<1x256x512xbf16>
    %52 = vector.shape_cast %51 : vector<1x256x512xbf16> to vector<256x512xbf16>
    %cst_30 = arith.constant dense<0.000000e+00> : vector<8x512xf32>
    %53 = tpu.matmul %50, %52, %cst_30 {dimension_numbers = #tpu.dot_dimension_numbers<[1], [0], [0], [1], [0, 0, 1, 1], [], []>} : vector<8x256xbf16>, vector<256x512xbf16>, vector<8x512xf32> -> vector<8x512xf32>
    %c1_31 = arith.constant 1 : index
    %c0_32 = arith.constant 0 : index
    %c0_33 = arith.constant 0 : index
    %54 = vector.load %arg5[%c1_31, %c0_32, %c0_33] : memref<2x1x512xf32, #tpu.memory_space<vmem>>, vector<1x1x512xf32>
    %55 = vector.shape_cast %54 : vector<1x1x512xf32> to vector<1x512xf32>
    %56 = vector.broadcast %55 : vector<1x512xf32> to vector<8x512xf32>
    %57 = arith.addf %53, %56 : vector<8x512xf32>
    %58 = vector.extract_strided_slice %57 {offsets = [0, 0], sizes = [8, 128], strides = [1, 1]} : vector<8x512xf32> to vector<8x128xf32>
    %59 = arith.negf %58 : vector<8x128xf32>
    %60 = math.exp %59 : vector<8x128xf32>
    %cst_34 = arith.constant 1.000000e+00 : f32
    %61 = vector.broadcast %cst_34 : f32 to vector<8x128xf32>
    %62 = arith.addf %61, %60 : vector<8x128xf32>
    %63 = arith.divf %61, %62 : vector<8x128xf32>
    %64 = vector.extract_strided_slice %57 {offsets = [0, 128], sizes = [8, 128], strides = [1, 1]} : vector<8x512xf32> to vector<8x128xf32>
    %65 = arith.negf %64 : vector<8x128xf32>
    %66 = math.exp %65 : vector<8x128xf32>
    %cst_35 = arith.constant 1.000000e+00 : f32
    %67 = vector.broadcast %cst_35 : f32 to vector<8x128xf32>
    %68 = arith.addf %67, %66 : vector<8x128xf32>
    %69 = arith.divf %67, %68 : vector<8x128xf32>
    %70 = vector.extract_strided_slice %57 {offsets = [0, 256], sizes = [8, 128], strides = [1, 1]} : vector<8x512xf32> to vector<8x128xf32>
    %71 = math.tanh %70 : vector<8x128xf32>
    %72 = vector.extract_strided_slice %57 {offsets = [0, 384], sizes = [8, 128], strides = [1, 1]} : vector<8x512xf32> to vector<8x128xf32>
    %73 = arith.negf %72 : vector<8x128xf32>
    %74 = math.exp %73 : vector<8x128xf32>
    %cst_36 = arith.constant 1.000000e+00 : f32
    %75 = vector.broadcast %cst_36 : f32 to vector<8x128xf32>
    %76 = arith.addf %75, %74 : vector<8x128xf32>
    %77 = arith.divf %75, %76 : vector<8x128xf32>
    %78 = arith.mulf %69, %48 : vector<8x128xf32>
    %79 = arith.mulf %63, %71 : vector<8x128xf32>
    %80 = arith.addf %78, %79 : vector<8x128xf32>
    %81 = math.tanh %80 : vector<8x128xf32>
    %82 = arith.mulf %77, %81 : vector<8x128xf32>
    %c1_37 = arith.constant 1 : index
    %c0_38 = arith.constant 0 : index
    %c0_39 = arith.constant 0 : index
    %83 = vector.load %arg6[%c1_37, %c0_38, %c0_39] : memref<2x8x128xf32, #tpu.memory_space<vmem>>, vector<1x8x128xf32>
    %84 = vector.shape_cast %83 : vector<1x8x128xf32> to vector<8x128xf32>
    %85 = vector.shape_cast %82 : vector<8x128xf32> to vector<1x8x128xf32>
    tpu.vector_store %arg6[%c1_37, %c0_38, %c0_39], %85 {strides = array<i32>} : memref<2x8x128xf32, #tpu.memory_space<vmem>>, vector<1x8x128xf32>,
    %c1_40 = arith.constant 1 : index
    %c0_41 = arith.constant 0 : index
    %c0_42 = arith.constant 0 : index
    %86 = vector.load %arg7[%c1_40, %c0_41, %c0_42] : memref<2x8x128xf32, #tpu.memory_space<vmem>>, vector<1x8x128xf32>
    %87 = vector.shape_cast %86 : vector<1x8x128xf32> to vector<8x128xf32>
    %88 = vector.shape_cast %80 : vector<8x128xf32> to vector<1x8x128xf32>
    tpu.vector_store %arg7[%c1_40, %c0_41, %c0_42], %88 {strides = array<i32>} : memref<2x8x128xf32, #tpu.memory_space<vmem>>, vector<1x8x128xf32>,
    return
  }
  func.func @transform_0(%arg0: i32) -> (i32, i32) {
    %c0_i32 = arith.constant 0 : i32
    %c0_i32_0 = arith.constant 0 : i32
    %c0_i32_1 = arith.constant 0 : i32
    return %c0_i32, %c0_i32_0 : i32, i32
  }
  func.func @transform_1(%arg0: i32) -> (i32, i32, i32) {
    %c0_i32 = arith.constant 0 : i32
    %c0_i32_0 = arith.constant 0 : i32
    %c0_i32_1 = arith.constant 0 : i32
    %c0_i32_2 = arith.constant 0 : i32
    return %c0_i32, %c0_i32_0, %c0_i32_1 : i32, i32, i32
  }
  func.func @transform_2(%arg0: i32) -> (i32, i32, i32) {
    %c0_i32 = arith.constant 0 : i32
    %c0_i32_0 = arith.constant 0 : i32
    %c0_i32_1 = arith.constant 0 : i32
    %c0_i32_2 = arith.constant 0 : i32
    return %c0_i32, %c0_i32_0, %c0_i32_1 : i32, i32, i32
  }
  func.func @transform_3(%arg0: i32) -> (i32, i32, i32) {
    %c0_i32 = arith.constant 0 : i32
    %c0_i32_0 = arith.constant 0 : i32
    %c0_i32_1 = arith.constant 0 : i32
    %c0_i32_2 = arith.constant 0 : i32
    return %c0_i32, %c0_i32_0, %c0_i32_1 : i32, i32, i32
  }
  func.func @transform_4(%arg0: i32) -> (i32, i32, i32) {
    %c0_i32 = arith.constant 0 : i32
    %c0_i32_0 = arith.constant 0 : i32
    %c0_i32_1 = arith.constant 0 : i32
    %c0_i32_2 = arith.constant 0 : i32
    return %c0_i32, %c0_i32_0, %c0_i32_1 : i32, i32, i32
  }
  func.func @transform_5(%arg0: i32) -> (i32, i32, i32) {
    %c0_i32 = arith.constant 0 : i32
    %c0_i32_0 = arith.constant 0 : i32
    %c0_i32_1 = arith.constant 0 : i32
    %c0_i32_2 = arith.constant 0 : i32
    return %c0_i32, %c0_i32_0, %c0_i32_1 : i32, i32, i32
  }
  func.func @transform_6(%arg0: i32) -> (i32, i32, i32) {
    %c0_i32 = arith.constant 0 : i32
    %c0_i32_0 = arith.constant 0 : i32
    %c0_i32_1 = arith.constant 0 : i32
    %c0_i32_2 = arith.constant 0 : i32
    return %c0_i32, %c0_i32_0, %c0_i32_1 : i32, i32, i32
  }
}

</mosaic_0001>

<bundles_post_ra>
// kernel: tpu_custom_call.1
= control target key start
LH: loop header
LB: loop body
LE: loop exit
PB: predicated region body
PF: predicated region fallthrough
CT: control target
= control target key end

     0   :  { %12 = vsyncpa [#allocation3], 0  ;;  %s1811_s0 = inlined_call_operand.hbm [shape: f32[8,128], index: 0, kind: input, shape index: {}]   ;;  %s1812_s1 = inlined_call_operand.hbm [shape: f32[2,8,128], index: 1, kind: input, shape index: {}]   ;;  %s1813_s2 = inlined_call_operand.hbm [shape: f32[2,8,128], index: 2, kind: input, shape index: {}]   ;;  %s1814_s3 = inlined_call_operand.hbm [shape: bf16[2,256,512], index: 3, kind: input, shape index: {}]   ;;  %s1815_s4 = inlined_call_operand.vmem [shape: f32[2,1,512], index: 4, kind: input, shape index: {}]   ;;  %s1816_s5 = inlined_call_operand.hbm [shape: f32[2,8,128], index: 5, kind: output, shape index: {0}]   ;;  %s1817_s6 = inlined_call_operand.hbm [shape: f32[2,8,128], index: 6, kind: output, shape index: {1}]  }
   0x1   :  { %13 = vsyncpa [#allocation6], 0 }
   0x2   :  { %14 = vsyncpa [#allocation9], 0 }
   0x3   :  { %15 = vsyncpa [#allocation4], 0 }
   0x4   :  { %16 = vsyncpa [#allocation12], 0  ;;  %s1666_s21 = smov [#allocation5]   ;;  %s1524_s25 = scalar_lea.hbm %s1812_s1, 256 }
   0x5   :  { %s32_s22 = sshll.u32 %s1666_s21, 4  ;;  %p1525_p0 = scmp.ne.s32.totalorder %s1812_s1, %s1524_s25  ;;  %s33_s22 = int_to_ptr.vmem [resolvable:$true] %s32_s22 }
   0x6   :  { %p1528_p1 = scmp.lt.u32.totalorder %s1524_s25, %s1812_s1 }
   0x8   :  { %p1530_p2 = pnand %p1528_p1, %p1525_p0 }
   0xa   :  { %1533 = shalt.err (!%p1530_p2)
}
   0xb   :  { %s1534_s30 = scalar_lea.vmem %s33_s22, 256  ;;  %p1539_p4 = scmp.lt.s32.totalorder %s33_s22, %s33_s22 }
   0xc   :  { %p1535_p3 = scmp.ne.s32.totalorder %s33_s22, %s1534_s30  ;;  %p1540_p5 = scmp.lt.s32.totalorder %s1534_s30, %s1534_s30 }
   0xe   :  { %p1541_p6 = por %p1540_p5, %p1539_p4 }
  0x10   :  { %p1542_p7 = pnand %p1541_p6, %p1535_p3 }
  0x12   :  { %1545 = shalt.err (!%p1542_p7)
}
  0x13   :  { %s1667_s7 = smov 128   ;;  %s1668_s8 = smov 8  }
  0x14   :  { %38 = dma.hbm_to_vmem [thread:$0]  %s1812_s1, 256, %s33_s22, [#allocation6], %s1667_s7, %s1667_s7, %s1668_s8  }
  0x15   :  { %s1669_s11 = smov [#allocation2]   ;;  %s1670_s13 = smov [#allocation7]  }
  0x16   :  { %s23_s12 = sshll.u32 %s1669_s11, 4  ;;  %s44_s14 = sshll.u32 %s1670_s13, 4  ;;  %s24_s12 = int_to_ptr.vmem [resolvable:$true] %s23_s12  ;;  %s45_s14 = int_to_ptr.vmem [resolvable:$true] %s44_s14 }
  0x17   :  { %s1546_s17 = scalar_lea.hbm %s1811_s0, 128 }
  0x18   :  { %p1547_p8 = scmp.ne.s32.totalorder %s1811_s0, %s1546_s17  ;;  %p1550_p9 = scmp.lt.u32.totalorder %s1546_s17, %s1811_s0 }
  0x1a   :  { %p1552_p10 = pnand %p1550_p9, %p1547_p8 }
  0x1c   :  { %1555 = shalt.err (!%p1552_p10)
}
  0x1d   :  { %s1556_s1 = scalar_lea.vmem %s24_s12, 128  ;;  %p1561_p12 = scmp.lt.s32.totalorder %s24_s12, %s24_s12 }
  0x1e   :  { %p1557_p11 = scmp.ne.s32.totalorder %s24_s12, %s1556_s1  ;;  %p1562_p13 = scmp.lt.s32.totalorder %s1556_s1, %s1556_s1 }
  0x20   :  { %p1563_p0 = por %p1562_p13, %p1561_p12 }
  0x22   :  { %p1564_p1 = pnand %p1563_p0, %p1557_p11 }
  0x24   :  { %1567 = shalt.err (!%p1564_p1)
}
  0x25   :  { %26 = dma.hbm_to_vmem [thread:$0]  %s1811_s0, 128, %s24_s12, [#allocation3]  }
  0x26   :  { %s1568_s26 = scalar_lea.hbm %s1813_s2, 256 }
  0x27   :  { %p1569_p2 = scmp.ne.s32.totalorder %s1813_s2, %s1568_s26  ;;  %p1572_p3 = scmp.lt.u32.totalorder %s1568_s26, %s1813_s2 }
  0x29   :  { %p1574_p4 = pnand %p1572_p3, %p1569_p2 }
  0x2b   :  { %1577 = shalt.err (!%p1574_p4)
}
  0x2c   :  { %s1578_s9 = scalar_lea.vmem %s45_s14, 256  ;;  %p1583_p6 = scmp.lt.s32.totalorder %s45_s14, %s45_s14 }
  0x2d   :  { %p1579_p5 = scmp.ne.s32.totalorder %s45_s14, %s1578_s9  ;;  %p1584_p7 = scmp.lt.s32.totalorder %s1578_s9, %s1578_s9 }
  0x2f   :  { %p1585_p8 = por %p1584_p7, %p1583_p6 }
  0x31   :  { %p1586_p9 = pnand %p1585_p8, %p1579_p5 }
  0x33   :  { %1589 = shalt.err (!%p1586_p9)
}
  0x34   :  { %50 = dma.hbm_to_vmem [thread:$0]  %s1813_s2, 256, %s45_s14, [#allocation6], %s1667_s7, %s1667_s7, %s1668_s8  }
  0x35   :  { %s1671_s11 = smov [#allocation8]   ;;  %s1590_s16 = scalar_lea.hbm %s1814_s3, 16384 }
  0x36   :  { %s56_s12 = sshll.u32 %s1671_s11, 4  ;;  %p1591_p10 = scmp.ne.s32.totalorder %s1814_s3, %s1590_s16  ;;  %s57_s12 = int_to_ptr.vmem [resolvable:$true] %s56_s12 }
  0x37   :  { %p1594_p11 = scmp.lt.u32.totalorder %s1590_s16, %s1814_s3 }
  0x39   :  { %p1596_p12 = pnand %p1594_p11, %p1591_p10 }
  0x3b   :  { %1599 = shalt.err (!%p1596_p12)
}
  0x3c   :  { %s1600_s21 = scalar_lea.vmem %s57_s12, 16384  ;;  %p1605_p0 = scmp.lt.s32.totalorder %s57_s12, %s57_s12 }
  0x3d   :  { %p1601_p13 = scmp.ne.s32.totalorder %s57_s12, %s1600_s21  ;;  %p1606_p1 = scmp.lt.s32.totalorder %s1600_s21, %s1600_s21 }
  0x3f   :  { %p1607_p2 = por %p1606_p1, %p1605_p0 }
  0x41   :  { %p1608_p3 = pnand %p1607_p2, %p1601_p13 }
  0x43   :  { %1611 = shalt.err (!%p1608_p3)
}
  0x44   :  { %s1672_s2 = smov 256   ;;  %s1673_s14 = smov 16  }
  0x45   :  { %62 = dma.hbm_to_vmem [thread:$0]  %s1814_s3, 16384, %s57_s12, [#allocation9], %s1672_s2, %s1672_s2, %s1673_s14  }
  0x46   :  { %1656 = dma.done.wait [#allocation3], 128  }
  0x47   :  { %1657 = vsyncadd [#allocation3], 4294967168 }
  0x48   :  { %1658 = dma.done.wait [#allocation6], 512  }
  0x49   :  { %1659 = vsyncadd [#allocation6], 4294966784 }
  0x4a   :  { %1660 = dma.done.wait [#allocation9], 16384  }
  0x4b   :  { %1661 = vsyncadd [#allocation9], 4294950912  ;;  %v1300_v0 = vld [vmem:[#allocation8 + $0x4] ss:$16 sps:$4 sm:$0xff]   ;;  %v1302_v1 = vld [vmem:[#allocation8] ss:$16 sps:$4 sm:$0xff]  }
  0x4c   :  { %488 = vmatprep.subr.bf16.mxu0 %v1300_v0  ;;  %v1303_v2 = vld [vmem:[#allocation8 + $0x24] ss:$16 sps:$4 sm:$0xff]   ;;  %v1305_v3 = vld [vmem:[#allocation8 + $0x20] ss:$16 sps:$4 sm:$0xff]   ;;  %v1311_v5 = vld [vmem:[#allocation8 + $0xc] ss:$16 sps:$4 sm:$0xff]  }
  0x4d   :  { %489 = vmatpush1.bf16.msra.mxu0 %v1302_v1  ;;  %v1306_v4 = vld [vmem:[#allocation8 + $0x44] ss:$16 sps:$4 sm:$0xff]   ;;  %v1314_v6 = vld [vmem:[#allocation8 + $0x8] ss:$16 sps:$4 sm:$0xff]   ;;  %v1308_v7 = vld [vmem:[#allocation8 + $0x40] ss:$16 sps:$4 sm:$0xff]   ;;  %529 = vmatprep.subr.bf16.mxu1 %v1311_v5 }
  0x4e   :  { %490 = vmatprep.subr.bf16.mxu0 %v1303_v2  ;;  %v1309_v8 = vld [vmem:[#allocation8 + $0x64] ss:$16 sps:$4 sm:$0xff]   ;;  %530 = vmatpush1.bf16.msra.mxu1 %v1314_v6  ;;  %v1317_v9 = vld [vmem:[#allocation8 + $0x2c] ss:$16 sps:$4 sm:$0xff]   ;;  %v1320_v10 = vld [vmem:[#allocation8 + $0x28] ss:$16 sps:$4 sm:$0xff]  }
  0x4f   :  { %531 = vmatprep.subr.bf16.mxu1 %v1317_v9  ;;  %v1313_v11 = vld [vmem:[#allocation8 + $0x60] ss:$16 sps:$4 sm:$0xff]   ;;  %v1315_v12 = vld [vmem:[#allocation8 + $0x84] ss:$16 sps:$4 sm:$0xff]   ;;  %v1323_v13 = vld [vmem:[#allocation8 + $0x4c] ss:$16 sps:$4 sm:$0xff]  }
  0x50   :  { %v1326_v14 = vld [vmem:[#allocation8 + $0x48] ss:$16 sps:$4 sm:$0xff]   ;;  %v1329_v15 = vld [vmem:[#allocation8 + $0x6c] ss:$16 sps:$4 sm:$0xff]   ;;  %v1319_v16 = vld [vmem:[#allocation8 + $0x80] ss:$16 sps:$4 sm:$0xff]  }
  0x51   :  { %491 = vmatpush1.bf16.msra.mxu0 %v1305_v3  ;;  %v1321_v17 = vld [vmem:[#allocation8 + $0xa4] ss:$16 sps:$4 sm:$0xff]   ;;  %v1332_v18 = vld [vmem:[#allocation8 + $0x68] ss:$16 sps:$4 sm:$0xff]   ;;  %v1335_v19 = vld [vmem:[#allocation8 + $0x8c] ss:$16 sps:$4 sm:$0xff]  }
  0x52   :  { %492 = vmatprep.subr.bf16.mxu0 %v1306_v4  ;;  %532 = vmatpush1.bf16.msra.mxu1 %v1320_v10  ;;  %v1325_v20 = vld [vmem:[#allocation8 + $0xa0] ss:$16 sps:$4 sm:$0xff]   ;;  %v1327_v21 = vld [vmem:[#allocation8 + $0xc4] ss:$16 sps:$4 sm:$0xff]   ;;  %v1338_v22 = vld [vmem:[#allocation8 + $0x88] ss:$16 sps:$4 sm:$0xff]  }
  0x53   :  { %533 = vmatprep.subr.bf16.mxu1 %v1323_v13  ;;  %v1341_v23 = vld [vmem:[#allocation8 + $0xac] ss:$16 sps:$4 sm:$0xff]   ;;  %v1331_v24 = vld [vmem:[#allocation8 + $0xc0] ss:$16 sps:$4 sm:$0xff]   ;;  %v1333_v25 = vld [vmem:[#allocation8 + $0xe4] ss:$16 sps:$4 sm:$0xff]  }
  0x54   :  { %v1344_v26 = vld [vmem:[#allocation8 + $0xa8] ss:$16 sps:$4 sm:$0xff]   ;;  %v1347_v27 = vld [vmem:[#allocation8 + $0xcc] ss:$16 sps:$4 sm:$0xff]   ;;  %v1337_v28 = vld [vmem:[#allocation8 + $0xe0] ss:$16 sps:$4 sm:$0xff]  }
  0x55   :  { %493 = vmatpush1.bf16.msra.mxu0 %v1308_v7  ;;  %v1339_v29 = vld [vmem:[#allocation8 + $0x104] ss:$16 sps:$4 sm:$0xff]   ;;  %v1350_v30 = vld [vmem:[#allocation8 + $0xc8] ss:$16 sps:$4 sm:$0xff]   ;;  %v1353_v31 = vld [vmem:[#allocation8 + $0xec] ss:$16 sps:$4 sm:$0xff]  }
  0x56   :  { %494 = vmatprep.subr.bf16.mxu0 %v1309_v8  ;;  %534 = vmatpush1.bf16.msra.mxu1 %v1326_v14  ;;  %v1343_v32 = vld [vmem:[#allocation8 + $0x100] ss:$16 sps:$4 sm:$0xff]   ;;  %v1345_v33 = vld [vmem:[#allocation8 + $0x124] ss:$16 sps:$4 sm:$0xff]   ;;  %v1356_v34 = vld [vmem:[#allocation8 + $0xe8] ss:$16 sps:$4 sm:$0xff]  }
  0x57   :  { %535 = vmatprep.subr.bf16.mxu1 %v1329_v15  ;;  %v1359_v35 = vld [vmem:[#allocation8 + $0x10c] ss:$16 sps:$4 sm:$0xff]   ;;  %v1349_v36 = vld [vmem:[#allocation8 + $0x120] ss:$16 sps:$4 sm:$0xff]   ;;  %v1351_v37 = vld [vmem:[#allocation8 + $0x144] ss:$16 sps:$4 sm:$0xff]  }
  0x58   :  { %v1362_v38 = vld [vmem:[#allocation8 + $0x108] ss:$16 sps:$4 sm:$0xff]   ;;  %v1365_v39 = vld [vmem:[#allocation8 + $0x12c] ss:$16 sps:$4 sm:$0xff]   ;;  %v78_v40 = vld [vmem:[#allocation5] sm:$0xff] }
  0x59   :  { %495 = vmatpush1.bf16.msra.mxu0 %v1313_v11  ;;  %v1355_v41 = vld [vmem:[#allocation8 + $0x140] ss:$16 sps:$4 sm:$0xff]   ;;  %v81_v42 = vpack.c.bf16 %v78_v40, %v78_v40  ;;  %v1357_v43 = vld [vmem:[#allocation8 + $0x164] ss:$16 sps:$4 sm:$0xff]   ;;  %v1368_v44 = vld [vmem:[#allocation8 + $0x128] ss:$16 sps:$4 sm:$0xff]  }
  0x5a   :  { %496 = vmatprep.subr.bf16.mxu0 %v1315_v12  ;;  %536 = vmatpush1.bf16.msra.mxu1 %v1332_v18  ;;  %v1371_v45 = vld [vmem:[#allocation8 + $0x14c] ss:$16 sps:$4 sm:$0xff]   ;;  %v1361_v46 = vld [vmem:[#allocation8 + $0x160] ss:$16 sps:$4 sm:$0xff]   ;;  %v1363_v47 = vld [vmem:[#allocation8 + $0x184] ss:$16 sps:$4 sm:$0xff]  }
  0x5b   :  { %537 = vmatprep.subr.bf16.mxu1 %v1335_v19  ;;  %520 = vmatprep.mubr.bf16.mxu0 %v81_v42  ;;  %v1374_v48 = vld [vmem:[#allocation8 + $0x148] ss:$16 sps:$4 sm:$0xff]   ;;  %v1377_v49 = vld [vmem:[#allocation8 + $0x16c] ss:$16 sps:$4 sm:$0xff]   ;;  %v1367_v50 = vld [vmem:[#allocation8 + $0x180] ss:$16 sps:$4 sm:$0xff]  }
  0x5c   :  { %561 = vmatprep.mubr.bf16.mxu1 %v81_v42  ;;  %v1369_v51 = vld [vmem:[#allocation8 + $0x1a4] ss:$16 sps:$4 sm:$0xff]   ;;  %v1380_v52 = vld [vmem:[#allocation8 + $0x168] ss:$16 sps:$4 sm:$0xff]   ;;  %v1383_v53 = vld [vmem:[#allocation8 + $0x18c] ss:$16 sps:$4 sm:$0xff]  }
  0x5d   :  { %497 = vmatpush1.bf16.msra.mxu0 %v1319_v16  ;;  %v1373_v54 = vld [vmem:[#allocation8 + $0x1a0] ss:$16 sps:$4 sm:$0xff]   ;;  %v1375_v55 = vld [vmem:[#allocation8 + $0x1c4] ss:$16 sps:$4 sm:$0xff]   ;;  %v1386_v56 = vld [vmem:[#allocation8 + $0x188] ss:$16 sps:$4 sm:$0xff]  }
  0x5e   :  { %498 = vmatprep.subr.bf16.mxu0 %v1321_v17  ;;  %538 = vmatpush1.bf16.msra.mxu1 %v1338_v22  ;;  %v1379_v57 = vld [vmem:[#allocation8 + $0x1c0] ss:$16 sps:$4 sm:$0xff]   ;;  %v1387_v58 = vld [vmem:[#allocation8 + $0x1ac] ss:$16 sps:$4 sm:$0xff]   ;;  %v1381_v59 = vld [vmem:[#allocation8 + $0x1e4] ss:$16 sps:$4 sm:$0xff]  }
  0x5f   :  { %539 = vmatprep.subr.bf16.mxu1 %v1341_v23  ;;  %v1389_v60 = vld [vmem:[#allocation8 + $0x1a8] ss:$16 sps:$4 sm:$0xff]   ;;  %v1390_v61 = vld [vmem:[#allocation8 + $0x1cc] ss:$16 sps:$4 sm:$0xff]   ;;  %v1385_v62 = vld [vmem:[#allocation8 + $0x1e0] ss:$16 sps:$4 sm:$0xff]  }
  0x60   :  { %v77_v63 = vld [vmem:[#allocation2] sm:$0xff]  ;;  %v1398_v1 = vld [vmem:[#allocation8 + $0x204] ss:$16 sps:$4 sm:$0xff]   ;;  %v1396_v3 = vld [vmem:[#allocation8 + $0x200] ss:$16 sps:$4 sm:$0xff]  }
  0x61   :  { %499 = vmatpush1.bf16.msra.mxu0 %v1325_v20  ;;  %v1392_v0 = vld [vmem:[#allocation8 + $0x1c8] ss:$16 sps:$4 sm:$0xff]   ;;  %v1393_v2 = vld [vmem:[#allocation8 + $0x1ec] ss:$16 sps:$4 sm:$0xff]   ;;  %v80_v4 = vpack.c.bf16 %v77_v63, %v77_v63  ;;  %v1404_v6 = vld [vmem:[#allocation8 + $0x224] ss:$16 sps:$4 sm:$0xff]  }
  0x62   :  { %500 = vmatprep.subr.bf16.mxu0 %v1327_v21  ;;  %540 = vmatpush1.bf16.msra.mxu1 %v1344_v26  ;;  %v1395_v5 = vld [vmem:[#allocation8 + $0x1e8] ss:$16 sps:$4 sm:$0xff]   ;;  %v1401_v7 = vld [vmem:[#allocation8 + $0x20c] ss:$16 sps:$4 sm:$0xff]   ;;  %v1402_v8 = vld [vmem:[#allocation8 + $0x220] ss:$16 sps:$4 sm:$0xff]  }
  0x63   :  { %541 = vmatprep.subr.bf16.mxu1 %v1347_v27  ;;  %v1399_v9 = vld [vmem:[#allocation8 + $0x208] ss:$16 sps:$4 sm:$0xff]   ;;  %v1410_v10 = vld [vmem:[#allocation8 + $0x244] ss:$16 sps:$4 sm:$0xff]   ;;  %v1407_v11 = vld [vmem:[#allocation8 + $0x22c] ss:$16 sps:$4 sm:$0xff]  }
  0x64   :  { %v1408_v12 = vld [vmem:[#allocation8 + $0x240] ss:$16 sps:$4 sm:$0xff]   ;;  %v1405_v13 = vld [vmem:[#allocation8 + $0x228] ss:$16 sps:$4 sm:$0xff]   ;;  %v1416_v14 = vld [vmem:[#allocation8 + $0x264] ss:$16 sps:$4 sm:$0xff]  }
  0x65   :  { %501 = vmatpush1.bf16.msra.mxu0 %v1331_v24  ;;  %v1413_v15 = vld [vmem:[#allocation8 + $0x24c] ss:$16 sps:$4 sm:$0xff]   ;;  %v1414_v16 = vld [vmem:[#allocation8 + $0x260] ss:$16 sps:$4 sm:$0xff]   ;;  %v1411_v17 = vld [vmem:[#allocation8 + $0x248] ss:$16 sps:$4 sm:$0xff]  }
  0x66   :  { %502 = vmatprep.subr.bf16.mxu0 %v1333_v25  ;;  %542 = vmatpush1.bf16.msra.mxu1 %v1350_v30  ;;  %v1419_v18 = vld [vmem:[#allocation8 + $0x26c] ss:$16 sps:$4 sm:$0xff]   ;;  %v1417_v19 = vld [vmem:[#allocation8 + $0x268] ss:$16 sps:$4 sm:$0xff]   ;;  %v1422_v20 = vld [vmem:[#allocation8 + $0x284] ss:$16 sps:$4 sm:$0xff]  }
  0x67   :  { %543 = vmatprep.subr.bf16.mxu1 %v1353_v31  ;;  %v1425_v21 = vld [vmem:[#allocation8 + $0x28c] ss:$16 sps:$4 sm:$0xff]   ;;  %v1420_v22 = vld [vmem:[#allocation8 + $0x280] ss:$16 sps:$4 sm:$0xff]   ;;  %v1423_v23 = vld [vmem:[#allocation8 + $0x288] ss:$16 sps:$4 sm:$0xff]  }
  0x68   :  { %v1428_v24 = vld [vmem:[#allocation8 + $0x2a4] ss:$16 sps:$4 sm:$0xff]   ;;  %v1431_v25 = vld [vmem:[#allocation8 + $0x2ac] ss:$16 sps:$4 sm:$0xff]   ;;  %v1426_v26 = vld [vmem:[#allocation8 + $0x2a0] ss:$16 sps:$4 sm:$0xff]  }
  0x69   :  { %503 = vmatpush1.bf16.msra.mxu0 %v1337_v28  ;;  %v1429_v27 = vld [vmem:[#allocation8 + $0x2a8] ss:$16 sps:$4 sm:$0xff]   ;;  %v1434_v28 = vld [vmem:[#allocation8 + $0x2c4] ss:$16 sps:$4 sm:$0xff]   ;;  %v1432_v30 = vld [vmem:[#allocation8 + $0x2c0] ss:$16 sps:$4 sm:$0xff]  }
  0x6a   :  { %504 = vmatprep.subr.bf16.mxu0 %v1339_v29  ;;  %544 = vmatpush1.bf16.msra.mxu1 %v1356_v34  ;;  %v1437_v29 = vld [vmem:[#allocation8 + $0x2cc] ss:$16 sps:$4 sm:$0xff]   ;;  %v1435_v31 = vld [vmem:[#allocation8 + $0x2c8] ss:$16 sps:$4 sm:$0xff]   ;;  %v1438_v34 = vld [vmem:[#allocation8 + $0x2e0] ss:$16 sps:$4 sm:$0xff]  }
  0x6b   :  { %545 = vmatprep.subr.bf16.mxu1 %v1359_v35  ;;  %v1441_v35 = vld [vmem:[#allocation8 + $0x2e8] ss:$16 sps:$4 sm:$0xff]   ;;  %v1452_v40 = vld [vmem:[#allocation8 + $0x324] ss:$16 sps:$4 sm:$0xff]   ;;  %v1450_v42 = vld [vmem:[#allocation8 + $0x320] ss:$16 sps:$4 sm:$0xff]  }
  0x6c   :  { %v1483_v63 = vld [vmem:[#allocation8 + $0x3c8] ss:$16 sps:$4 sm:$0xff]  }
  0x6d   :  { %505 = vmatpush1.bf16.msra.mxu0 %v1343_v32  ;;  %v1440_v32 = vld [vmem:[#allocation8 + $0x2e4] ss:$16 sps:$4 sm:$0xff]  }
  0x6e   :  { %506 = vmatprep.subr.bf16.mxu0 %v1345_v33  ;;  %546 = vmatpush1.bf16.msra.mxu1 %v1362_v38  ;;  %v1443_v33 = vld [vmem:[#allocation8 + $0x2ec] ss:$16 sps:$4 sm:$0xff]   ;;  %v1444_v38 = vld [vmem:[#allocation8 + $0x300] ss:$16 sps:$4 sm:$0xff]  }
  0x6f   :  { %547 = vmatprep.subr.bf16.mxu1 %v1365_v39  ;;  %v1447_v39 = vld [vmem:[#allocation8 + $0x308] ss:$16 sps:$4 sm:$0xff]  }
  0x71   :  { %507 = vmatpush1.bf16.msra.mxu0 %v1349_v36  ;;  %v1446_v36 = vld [vmem:[#allocation8 + $0x304] ss:$16 sps:$4 sm:$0xff]  }
  0x72   :  { %508 = vmatprep.subr.bf16.mxu0 %v1351_v37  ;;  %548 = vmatpush1.bf16.msra.mxu1 %v1368_v44  ;;  %v1449_v37 = vld [vmem:[#allocation8 + $0x30c] ss:$16 sps:$4 sm:$0xff]   ;;  %v1458_v44 = vld [vmem:[#allocation8 + $0x344] ss:$16 sps:$4 sm:$0xff]  }
  0x73   :  { %549 = vmatprep.subr.bf16.mxu1 %v1371_v45  ;;  %v1461_v45 = vld [vmem:[#allocation8 + $0x34c] ss:$16 sps:$4 sm:$0xff]  }
  0x75   :  { %509 = vmatpush1.bf16.msra.mxu0 %v1355_v41  ;;  %v1455_v41 = vld [vmem:[#allocation8 + $0x32c] ss:$16 sps:$4 sm:$0xff]  }
  0x76   :  { %510 = vmatprep.subr.bf16.mxu0 %v1357_v43  ;;  %550 = vmatpush1.bf16.msra.mxu1 %v1374_v48  ;;  %v1453_v43 = vld [vmem:[#allocation8 + $0x328] ss:$16 sps:$4 sm:$0xff]   ;;  %v1464_v48 = vld [vmem:[#allocation8 + $0x364] ss:$16 sps:$4 sm:$0xff]  }
  0x77   :  { %551 = vmatprep.subr.bf16.mxu1 %v1377_v49  ;;  %v1467_v49 = vld [vmem:[#allocation8 + $0x36c] ss:$16 sps:$4 sm:$0xff]  }
  0x79   :  { %511 = vmatpush1.bf16.msra.mxu0 %v1361_v46  ;;  %v1456_v46 = vld [vmem:[#allocation8 + $0x340] ss:$16 sps:$4 sm:$0xff]  }
  0x7a   :  { %512 = vmatprep.subr.bf16.mxu0 %v1363_v47  ;;  %552 = vmatpush1.bf16.msra.mxu1 %v1380_v52  ;;  %v1459_v47 = vld [vmem:[#allocation8 + $0x348] ss:$16 sps:$4 sm:$0xff]   ;;  %v1470_v52 = vld [vmem:[#allocation8 + $0x384] ss:$16 sps:$4 sm:$0xff]  }
  0x7b   :  { %553 = vmatprep.subr.bf16.mxu1 %v1383_v53  ;;  %v1473_v53 = vld [vmem:[#allocation8 + $0x38c] ss:$16 sps:$4 sm:$0xff]  }
  0x7d   :  { %513 = vmatpush1.bf16.msra.mxu0 %v1367_v50  ;;  %v1462_v50 = vld [vmem:[#allocation8 + $0x360] ss:$16 sps:$4 sm:$0xff]  }
  0x7e   :  { %514 = vmatprep.subr.bf16.mxu0 %v1369_v51  ;;  %554 = vmatpush1.bf16.msra.mxu1 %v1386_v56  ;;  %v1465_v51 = vld [vmem:[#allocation8 + $0x368] ss:$16 sps:$4 sm:$0xff]   ;;  %v1474_v56 = vld [vmem:[#allocation8 + $0x3a0] ss:$16 sps:$4 sm:$0xff]  }
  0x7f   :  { %555 = vmatprep.subr.bf16.mxu1 %v1387_v58  ;;  %v1477_v58 = vld [vmem:[#allocation8 + $0x3a8] ss:$16 sps:$4 sm:$0xff]  }
  0x81   :  { %515 = vmatpush1.bf16.msra.mxu0 %v1373_v54  ;;  %v1468_v54 = vld [vmem:[#allocation8 + $0x380] ss:$16 sps:$4 sm:$0xff]  }
  0x82   :  { %516 = vmatprep.subr.bf16.mxu0 %v1375_v55  ;;  %556 = vmatpush1.bf16.msra.mxu1 %v1389_v60  ;;  %v1471_v55 = vld [vmem:[#allocation8 + $0x388] ss:$16 sps:$4 sm:$0xff]   ;;  %v1482_v60 = vld [vmem:[#allocation8 + $0x3c4] ss:$16 sps:$4 sm:$0xff]  }
  0x83   :  { %557 = vmatprep.subr.bf16.mxu1 %v1390_v61  ;;  %v1485_v61 = vld [vmem:[#allocation8 + $0x3cc] ss:$16 sps:$4 sm:$0xff]  }
  0x85   :  { %517 = vmatpush1.bf16.msra.mxu0 %v1379_v57  ;;  %v1476_v57 = vld [vmem:[#allocation8 + $0x3a4] ss:$16 sps:$4 sm:$0xff]  }
  0x86   :  { %518 = vmatprep.subr.bf16.mxu0 %v1381_v59  ;;  %558 = vmatpush1.bf16.msra.mxu1 %v1392_v0  ;;  %v1479_v59 = vld [vmem:[#allocation8 + $0x3ac] ss:$16 sps:$4 sm:$0xff]  }
  0x87   :  { %559 = vmatprep.subr.bf16.mxu1 %v1393_v2  ;;  %v597_v0 = vld [vmem:[#allocation5 + $0x8] sm:$0xff] }
  0x88   :  { %v1491_v2 = vld [vmem:[#allocation8 + $0x3ec] ss:$16 sps:$4 sm:$0xff]  }
  0x89   :  { %519 = vmatpush1.bf16.msra.mxu0 %v1385_v62  ;;  %v1480_v62 = vld [vmem:[#allocation8 + $0x3c0] ss:$16 sps:$4 sm:$0xff]  }
  0x8a   :  { %1010 = vmatprep.subr.bf16.mxu0 %v1398_v1  ;;  %560 = vmatpush1.bf16.msra.mxu1 %v1395_v5  ;;  %v1488_v1 = vld [vmem:[#allocation8 + $0x3e4] ss:$16 sps:$4 sm:$0xff]   ;;  %v1489_v5 = vld [vmem:[#allocation8 + $0x3e8] ss:$16 sps:$4 sm:$0xff]  }
  0x8b   :  { %1051 = vmatprep.subr.bf16.mxu1 %v1401_v7 }
  0x8c   :  { %521 = vmatmul.mubr.bf16.vlgmr.msra.gmra.mrb[0].mxu0 %v80_v4 }
  0x8d   :  { %1011 = vmatpush1.bf16.msra.mxu0 %v1396_v3  ;;  %562 = vmatmul.mubr.bf16.vlgmr.msra.gmra.mrb[0].mxu1 %v80_v4  ;;  %v601_v3 = vpack.c.bf16 %v597_v0, %v597_v0  ;;  %v1486_v4 = vld [vmem:[#allocation8 + $0x3e0] ss:$16 sps:$4 sm:$0xff]  }
  0x8e   :  { %1012 = vmatprep.subr.bf16.mxu0 %v1404_v6  ;;  %1052 = vmatpush1.bf16.msra.mxu1 %v1399_v9  ;;  %v148_v6 = vlaneseq  ;;  %v146_v9 = vld [vmem:[%s1815_s4] sm:$0xf] }
  0x8f   :  { %1053 = vmatprep.subr.bf16.mxu1 %v1407_v11  ;;  %1042 = vmatprep.mubr.bf16.mxu0 %v601_v3 }
  0x90   :  { %1083 = vmatprep.mubr.bf16.mxu1 %v601_v3  ;;  %v1765_v7 = vshrl.u32 %v148_v6, 7 }
  0x91   :  { %1013 = vmatpush1.bf16.msra.mxu0 %v1402_v8 }
  0x92   :  { %1014 = vmatprep.subr.bf16.mxu0 %v1410_v10  ;;  %1054 = vmatpush1.bf16.msra.mxu1 %v1405_v13  ;;  %v150_v8 = vsub.s32 0, %v1765_v7  ;;  %v154_v10 = vsub.s32 1, %v1765_v7  ;;  %v162_v13 = vsub.s32 3, %v1765_v7 }
  0x93   :  { %1055 = vmatprep.subr.bf16.mxu1 %v1413_v15 }
  0x94   :  { %v151_v11 = vrot.slane %v146_v9, %v150_v8 }
  0x95   :  { %1015 = vmatpush1.bf16.msra.mxu0 %v1408_v12  ;;  %v155_v12 = vrot.slane %v146_v9, %v154_v10 }
  0x96   :  { %1016 = vmatprep.subr.bf16.mxu0 %v1416_v14  ;;  %1056 = vmatpush1.bf16.msra.mxu1 %v1411_v17 }
  0x97   :  { %1057 = vmatprep.subr.bf16.mxu1 %v1419_v18 }
  0x99   :  { %1017 = vmatpush1.bf16.msra.mxu0 %v1414_v16 }
  0x9a   :  { %1058 = vmatpush1.bf16.msra.mxu1 %v1417_v19  ;;  %1018 = vmatprep.subr.bf16.mxu0 %v1422_v20 }
  0x9b   :  { %1059 = vmatprep.subr.bf16.mxu1 %v1425_v21  ;;  %v163_v21 = vrot.slane %v146_v9, %v162_v13 }
  0x9d   :  { %1019 = vmatpush1.bf16.msra.mxu0 %v1420_v22 }
  0x9e   :  { %1060 = vmatpush1.bf16.msra.mxu1 %v1423_v23  ;;  %1020 = vmatprep.subr.bf16.mxu0 %v1428_v24  ;;  %v158_v23 = vsub.s32 2, %v1765_v7 }
  0x9f   :  { %1061 = vmatprep.subr.bf16.mxu1 %v1431_v25 }
  0xa1   :  { %1021 = vmatpush1.bf16.msra.mxu0 %v1426_v26 }
  0xa2   :  { %1062 = vmatpush1.bf16.msra.mxu1 %v1429_v27  ;;  %1022 = vmatprep.subr.bf16.mxu0 %v1434_v28  ;;  %v159_v28 = vrot.slane %v146_v9, %v158_v23 }
  0xa3   :  { %1063 = vmatprep.subr.bf16.mxu1 %v1437_v29 }
  0xa5   :  { %1023 = vmatpush1.bf16.msra.mxu0 %v1432_v30 }
  0xa6   :  { %1064 = vmatpush1.bf16.msra.mxu1 %v1435_v31  ;;  %1024 = vmatprep.subr.bf16.mxu0 %v1440_v32 }
  0xa7   :  { %1065 = vmatprep.subr.bf16.mxu1 %v1443_v33 }
  0xa9   :  { %1025 = vmatpush1.bf16.msra.mxu0 %v1438_v34 }
  0xaa   :  { %1066 = vmatpush1.bf16.msra.mxu1 %v1441_v35  ;;  %1026 = vmatprep.subr.bf16.mxu0 %v1446_v36 }
  0xab   :  { %1067 = vmatprep.subr.bf16.mxu1 %v1449_v37 }
  0xad   :  { %1027 = vmatpush1.bf16.msra.mxu0 %v1444_v38  ;;  %v79_v38 = vld [vmem:[#allocation7] sm:$0xff] }
  0xae   :  { %1068 = vmatpush1.bf16.msra.mxu1 %v1447_v39  ;;  %1028 = vmatprep.subr.bf16.mxu0 %v1452_v40 }
  0xaf   :  { %1069 = vmatprep.subr.bf16.mxu1 %v1455_v41 }
  0xb1   :  { %1029 = vmatpush1.bf16.msra.mxu0 %v1450_v42 }
  0xb2   :  { %1070 = vmatpush1.bf16.msra.mxu1 %v1453_v43  ;;  %1030 = vmatprep.subr.bf16.mxu0 %v1458_v44 }
  0xb3   :  { %1071 = vmatprep.subr.bf16.mxu1 %v1461_v45 }
  0xb5   :  { %1031 = vmatpush1.bf16.msra.mxu0 %v1456_v46 }
  0xb6   :  { %1072 = vmatpush1.bf16.msra.mxu1 %v1459_v47  ;;  %1032 = vmatprep.subr.bf16.mxu0 %v1464_v48 }
  0xb7   :  { %1073 = vmatprep.subr.bf16.mxu1 %v1467_v49  ;;  %v1222_v49 = vld [vmem:[%s1815_s4 + $0x4] sm:$0xf]  ;;  %s1674_s4 = smov [#allocation11]  }
  0xb8   :  { %v685_v0 = vrot.slane %v1222_v49, %v162_v13  ;;  %s1137_s26 = sshll.u32 %s1674_s4, 4  ;;  %s1138_s26 = int_to_ptr.vmem [resolvable:$true] %s1137_s26 }
  0xb9   :  { %1033 = vmatpush1.bf16.msra.mxu0 %v1462_v50  ;;  %v673_v50 = vrot.slane %v1222_v49, %v150_v8  ;;  %s1612_s27 = scalar_lea.vmem %s1138_s26, 256  ;;  %p1617_p5 = scmp.lt.s32.totalorder %s1138_s26, %s1138_s26 }
  0xba   :  { %1074 = vmatpush1.bf16.msra.mxu1 %v1465_v51  ;;  %1034 = vmatprep.subr.bf16.mxu0 %v1470_v52  ;;  %v677_v51 = vrot.slane %v1222_v49, %v154_v10  ;;  %p1613_p4 = scmp.ne.s32.totalorder %s1138_s26, %s1612_s27  ;;  %p1618_p6 = scmp.lt.s32.totalorder %s1612_s27, %s1612_s27 }
  0xbb   :  { %1075 = vmatprep.subr.bf16.mxu1 %v1473_v53 }
  0xbc   :  { %p1619_p7 = por %p1618_p6, %p1617_p5 }
  0xbd   :  { %1035 = vmatpush1.bf16.msra.mxu0 %v1468_v54 }
  0xbe   :  { %1076 = vmatpush1.bf16.msra.mxu1 %v1471_v55  ;;  %1036 = vmatprep.subr.bf16.mxu0 %v1476_v57  ;;  %p1620_p8 = pnand %p1619_p7, %p1613_p4 }
  0xbf   :  { %1077 = vmatprep.subr.bf16.mxu1 %v1479_v59 }
  0xc1   :  { %1037 = vmatpush1.bf16.msra.mxu0 %v1474_v56 }
  0xc2   :  { %1078 = vmatpush1.bf16.msra.mxu1 %v1477_v58  ;;  %1038 = vmatprep.subr.bf16.mxu0 %v1482_v60 }
  0xc3   :  { %1079 = vmatprep.subr.bf16.mxu1 %v1485_v61 }
  0xc5   :  { %1039 = vmatpush1.bf16.msra.mxu0 %v1480_v62 }
  0xc6   :  { %1080 = vmatpush1.bf16.msra.mxu1 %v1483_v63  ;;  %1040 = vmatprep.subr.bf16.mxu0 %v1488_v1 }
  0xc7   :  { %1081 = vmatprep.subr.bf16.mxu1 %v1491_v2  ;;  %v681_v2 = vrot.slane %v1222_v49, %v158_v23 }
  0xc9   :  { %1041 = vmatpush1.bf16.msra.mxu0 %v1486_v4 }
  0xca   :  { %1082 = vmatpush1.bf16.msra.mxu1 %v1489_v5 }
 0x15f   :  { %v522_v14 = vpop.f32.mrb[0].mxu0 }
 0x160   :  { %v523_v15 = vadd.f32 %v522_v14, %v151_v11  ;;  %v524_v16 = vpop.f32.mrb[1].mxu0  ;;  %v563_v24 = vpop.f32.mrb[0].mxu1 }
 0x161   :  { %v525_v17 = vadd.f32 %v524_v16, %v155_v12  ;;  %v526_v18 = vpop.f32.mrb[2].mxu0  ;;  %v565_v25 = vpop.f32.mrb[1].mxu1  ;;  %v564_v31 = vadd.f32 %v563_v24, %v159_v28  ;;  %v599_v12 = vld [vmem:[#allocation7 + $0x8] sm:$0xff] }
 0x162   :  { %v1219_v19 = vmul.f32 -1.442695, %v523_v15  ;;  %v527_v20 = vpop.f32.mrb[3].mxu0  ;;  %v566_v26 = vadd.f32 %v565_v25, %v163_v21  ;;  %v567_v27 = vpop.f32.mrb[2].mxu1 }
 0x163   :  { %v1220_v22 = vmul.f32 -1.442695, %v525_v17  ;;  %v568_v29 = vpop.f32.mrb[3].mxu1 }
 0x164   :  { %1492 = vpow2.f32 %v1219_v19  ;;  %v1221_v30 = vmul.f32 -1.442695, %v566_v26 }
 0x165   :  { %1494 = vpow2.f32 %v1220_v22 }
 0x166   :  { %1496 = vpow2.f32 %v1221_v30 }
 0x167   :  { %1498 = vtanh.f32 %v564_v31 }
 0x16e   :  { %v1493_v32 = vpop.eup %1492 }
 0x16f   :  { %v1495_v33 = vpop.eup %1494  ;;  %v573_v34 = vadd.f32 1.0, %v1493_v32 }
 0x170   :  { %v579_v35 = vadd.f32 1.0, %v1495_v33  ;;  %v1497_v36 = vpop.eup %1496 }
 0x171   :  { %1500 = vrcp.f32 %v573_v34  ;;  %v1499_v37 = vpop.eup %1498  ;;  %v586_v40 = vadd.f32 1.0, %v1497_v36 }
 0x172   :  { %1502 = vrcp.f32 %v579_v35 }
 0x173   :  { %1504 = vrcp.f32 %v586_v40 }
 0x17b   :  { %v1501_v39 = vpop.eup %1500 }
 0x17c   :  { %v1503_v41 = vpop.eup %1502  ;;  %v590_v42 = vmul.f32 %v1501_v39, %v1499_v37 }
 0x17d   :  { %v589_v43 = vmul.f32 %v1503_v41, %v79_v38  ;;  %v1505_v45 = vpop.eup %1504 }
 0x17f   :  { %v591_v44 = vadd.f32 %v590_v42, %v589_v43 }
 0x181   :  { %1506 = vtanh.f32 %v591_v44  ;;  %595 = vst [vmem:[#allocation11] sm:$0xff] %v591_v44 }
 0x18b   :  { %v1507_v46 = vpop.eup %1506 }
 0x18c   :  { %v593_v47 = vmul.f32 %v1507_v46, %v1505_v45 }
 0x18e   :  { %v600_v48 = vpack.c.bf16 %v593_v47, %v593_v47  ;;  %594 = vst [vmem:[#allocation10] sm:$0xff] %v593_v47 }
 0x190   :  { %1043 = vmatmul.mubr.bf16.vlgmr.msra.gmra.mrb[4].mxu0 %v600_v48  ;;  %1084 = vmatmul.mubr.bf16.vlgmr.msra.gmra.mrb[4].mxu1 %v600_v48 }
 0x263   :  { %v1044_v52 = vpop.f32.mrb[4].mxu0  ;;  %v1085_v53 = vpop.f32.mrb[4].mxu1 }
 0x264   :  { %v1045_v54 = vadd.f32 %v1044_v52, %v673_v50  ;;  %v1046_v55 = vpop.f32.mrb[5].mxu0  ;;  %v1087_v56 = vpop.f32.mrb[5].mxu1  ;;  %v1086_v4 = vadd.f32 %v1085_v53, %v681_v2 }
 0x265   :  { %v1047_v57 = vadd.f32 %v1046_v55, %v677_v51  ;;  %v1048_v58 = vpop.f32.mrb[6].mxu0  ;;  %v1089_v59 = vpop.f32.mrb[6].mxu1  ;;  %v1088_v1 = vadd.f32 %v1087_v56, %v685_v0 }
 0x266   :  { %v1287_v60 = vmul.f32 -1.442695, %v1045_v54  ;;  %v1049_v61 = vpop.f32.mrb[7].mxu0  ;;  %v1090_v62 = vpop.f32.mrb[7].mxu1 }
 0x267   :  { %v1288_v63 = vmul.f32 -1.442695, %v1047_v57  ;;  %v1289_v3 = vmul.f32 -1.442695, %v1088_v1 }
 0x268   :  { %1508 = vpow2.f32 %v1287_v60 }
 0x269   :  { %1510 = vpow2.f32 %v1288_v63 }
 0x26a   :  { %1512 = vpow2.f32 %v1289_v3 }
 0x26b   :  { %1514 = vtanh.f32 %v1086_v4 }
 0x272   :  { %v1509_v5 = vpop.eup %1508 }
 0x273   :  { %v1511_v6 = vpop.eup %1510  ;;  %v1095_v8 = vadd.f32 1.0, %v1509_v5 }
 0x274   :  { %v1101_v9 = vadd.f32 1.0, %v1511_v6  ;;  %v1513_v10 = vpop.eup %1512 }
 0x275   :  { %1516 = vrcp.f32 %v1095_v8  ;;  %v1515_v11 = vpop.eup %1514  ;;  %v1108_v15 = vadd.f32 1.0, %v1513_v10 }
 0x276   :  { %1518 = vrcp.f32 %v1101_v9 }
 0x277   :  { %1520 = vrcp.f32 %v1108_v15 }
 0x27f   :  { %v1517_v14 = vpop.eup %1516 }
 0x280   :  { %v1519_v7 = vpop.eup %1518  ;;  %v1112_v13 = vmul.f32 %v1517_v14, %v1515_v11 }
 0x281   :  { %v1111_v16 = vmul.f32 %v1519_v7, %v599_v12 }
 0x283   :  { %v1113_v17 = vadd.f32 %v1112_v13, %v1111_v16 }
 0x285   :  { %1119 = vst [vmem:[#allocation11 + $0x8] sm:$0xff] %v1113_v17  ;;  %1522 = vtanh.f32 %v1113_v17 }
 0x286   :  { %1623 = shalt.err (!%p1620_p8)
}
 0x287   :  { %s1624_s30 = scalar_lea.hbm %s1817_s6, 256 }
 0x288   :  { %p1625_p9 = scmp.ne.s32.totalorder %s1817_s6, %s1624_s30  ;;  %p1628_p10 = scmp.lt.u32.totalorder %s1624_s30, %s1817_s6 }
 0x28a   :  { %p1630_p11 = pnand %p1628_p10, %p1625_p9 }
 0x28c   :  { %1633 = shalt.err (!%p1630_p11)
}
 0x28d   :  { %1143 = dma.vmem_to_hbm [thread:$0]  %s1138_s26, 256, %s1817_s6, [#allocation12], %s1667_s7, %s1667_s7, %s1668_s8   ;;  %v1521_v18 = vpop.eup %1520 }
 0x28e   :  { %s1675_s15 = smov [#allocation10]  }
 0x28f   :  { %s1125_s16 = sshll.u32 %s1675_s15, 4  ;;  %v1523_v19 = vpop.eup %1522  ;;  %s1126_s16 = int_to_ptr.vmem [resolvable:$true] %s1125_s16 }
 0x290   :  { %v1115_v20 = vmul.f32 %v1523_v19, %v1521_v18  ;;  %s1634_s17 = scalar_lea.vmem %s1126_s16, 256  ;;  %p1639_p13 = scmp.lt.s32.totalorder %s1126_s16, %s1126_s16 }
 0x291   :  { %p1635_p12 = scmp.ne.s32.totalorder %s1126_s16, %s1634_s17  ;;  %p1640_p0 = scmp.lt.s32.totalorder %s1634_s17, %s1634_s17 }
 0x292   :  { %1117 = vst [vmem:[#allocation10 + $0x8] sm:$0xff] %v1115_v20 }
 0x293   :  { %p1641_p1 = por %p1640_p0, %p1639_p13 }
 0x295   :  { %p1642_p2 = pnand %p1641_p1, %p1635_p12 }
 0x297   :  { %1645 = shalt.err (!%p1642_p2)
}
 0x298   :  { %s1646_s20 = scalar_lea.hbm %s1816_s5, 256 }
 0x299   :  { %p1647_p3 = scmp.ne.s32.totalorder %s1816_s5, %s1646_s20  ;;  %p1650_p4 = scmp.lt.u32.totalorder %s1646_s20, %s1816_s5 }
 0x29b   :  { %p1652_p5 = pnand %p1650_p4, %p1647_p3 }
 0x29d   :  { %1655 = shalt.err (!%p1652_p5)
}
 0x29e   :  { %1131 = dma.vmem_to_hbm [thread:$0]  %s1126_s16, 256, %s1816_s5, [#allocation4], %s1667_s7, %s1667_s7, %s1668_s8  }
 0x29f   :  { %1662 = dma.done.wait [#allocation4], 256  }
 0x2a0   :  { %1663 = vsyncadd [#allocation4], 4294967040 }
 0x2a1   :  { %1664 = dma.done.wait [#allocation12], 256  }
 0x2a2   :  { %1665 = vsyncadd [#allocation12], 4294967040 }
 0x2a3   :  { %1150 = vsyncpa [#allocation3], 1 }
 0x2a4   :  { %1151 = vsyncpa [#allocation6], 1 }
 0x2a5   :  { %1152 = vsyncpa [#allocation9], 1 }
 0x2a6   :  { %1153 = vsyncpa [#allocation4], 1 }
 0x2a7   :  { %1154 = vsyncpa [#allocation12], 1 }

</bundles_post_ra>
